<compile_context>
chip_gen: v6e
topology: v6e:2x2x1
jax: 0.10.0
libtpu: 0.0.40
codegen_flags: <defaults>
</compile_context>

<pallas_src>
import functools

import numpy as np
import jax
import jax.numpy as jnp
from jax import lax
from jax.experimental import pallas as pl
from jax.experimental.pallas import tpu as pltpu


# ----------------------------------------------------------------------------
# Pallas kernel: per batch element n, accumulate all J masked grams over HW
# tiles; write the scaled grams on the last tile.
# ----------------------------------------------------------------------------
def _masked_gram_kernel(feat_ref, mask_ref, gram_ref, acc_ref, *,
                        j_count, c, inv_scale, stack_j):
    # feat_ref: (1, C, T)    bf16 feature tile for batch n, HW-tile k
    # mask_ref: (J, 1, T)    bf16 pre-squared color-code masks for HW-tile k
    # gram_ref: (1, J*C, C)  f32 scaled masked grams (written on last k)
    # acc_ref : (J*C, C)     f32 gram accumulator, resident across the k axis
    k = pl.program_id(1)

    @pl.when(k == 0)
    def _():
        acc_ref[...] = jnp.zeros_like(acc_ref)

    feat = feat_ref[0]                      # (C, T)
    m2 = mask_ref[...]                      # (J, 1, T), already mask**2

    if stack_j:
        # Small C: stack the J masked copies along M so a single (J*C,T)x(C,T)
        # contraction feeds the MXU instead of J tiny matmuls.
        stacked = (feat[None, :, :] * m2).reshape(j_count * c, feat.shape[-1])
        acc_ref[...] += lax.dot_general(
            stacked, feat,
            dimension_numbers=(((1,), (1,)), ((), ())),   # contract HW (lanes)
            preferred_element_type=jnp.float32)
    else:
        # Large C: the MXU M-dim is already full, so stacking only costs VMEM.
        # Per-j unroll keeps the masked temp at (C,T) -- same size as the tile.
        for j in range(j_count):            # static unroll, J is small
            masked = feat * m2[j]            # (C, T)
            acc_ref[j * c:(j + 1) * c, :] += lax.dot_general(
                masked, feat,
                dimension_numbers=(((1,), (1,)), ((), ())),
                preferred_element_type=jnp.float32)
    # TODO(synk): for the MXU-bound large-C regime, inspect the Mosaic lowering
    # for a per-step vxpose of the rhs (it would share vector-extended slots
    # with the vmatmul pushes) and restructure the rhs contraction if present.

    @pl.when(k == pl.num_programs(1) - 1)
    def _():
        gram_ref[0] = acc_ref[...] * inv_scale


def _pick_vmem_limit_bytes():
    # ~75% of physical VMEM, capped: v5e/v6e (128 MiB phys) -> 96 MiB,
    # v7x (64 MiB phys) -> 48 MiB.  Fallback fits every generation.
    try:
        cap = int(pltpu.get_tpu_info().vmem_capacity_bytes)
    except Exception:
        cap = 64 * 1024 * 1024
    return min(96 * 1024 * 1024, (3 * cap) // 4)


def style_loss_seg_forward(x, input_masks, targets, weight, *,
                           hw_tile=None, use_bf16=True):
    """Forward of StyleLoss_Seg in 'loss' mode.

    x           : (N, C, H, W) feature map
    input_masks : (J, 1, 1, H, W) per-color-code masks
    targets     : (J, N, C, C) captured target grams (f32)
    weight      : python float style weight
    Returns (input unchanged, scalar loss).
    """
    N, C, H, W = x.shape
    J = input_masks.shape[0]
    HW = H * W

    feats = x.reshape(N, C, HW)
    masks = input_masks.reshape(J, 1, HW).astype(jnp.float32)
    # Per-j mask mean (loss weighting), computed before padding.
    msk_mean = jnp.mean(masks.reshape(J, HW), axis=1)                  # (J,)
    # Single-sided masking: gram(feat*m) == (feat*m^2) @ feat^T, so square the
    # mask once here instead of per HW-tile inside the kernel.
    masks = masks * masks

    # bf16 streams: halve the dominant feature DMA and the stacked VMEM temp;
    # MXU runs bf16 passes anyway and accumulation stays f32 in the kernel.
    stream_dtype = jnp.bfloat16 if use_bf16 else jnp.float32
    feats = feats.astype(stream_dtype)
    masks = masks.astype(stream_dtype)

    # HW tile: ~1 MiB bf16 feature tile per step (8192 for C<=64 down to 1024
    # at C=512), lane-aligned; HW is zero-padded to a tile multiple (zero
    # columns contribute nothing to the gram).
    if hw_tile is None:
        hw_tile = max(512, min(8192, (1 << 20) // (2 * C)))
    T = max(128, min(hw_tile, HW))
    T = ((T + 127) // 128) * 128
    HW_pad = ((HW + T - 1) // T) * T
    if HW_pad != HW:
        feats = jnp.pad(feats, ((0, 0), (0, 0), (0, HW_pad - HW)))
        masks = jnp.pad(masks, ((0, 0), (0, 0), (0, HW_pad - HW)))
    K = HW_pad // T

    # j-stacking only pays when C is small; it also needs C to be a sublane
    # multiple so the (J,C,T)->(J*C,T) reshape is layout-free.
    stack_j = (C % 8 == 0) and (C < 256)

    kernel = functools.partial(
        _masked_gram_kernel,
        j_count=J, c=C, inv_scale=1.0 / float(C * H * W), stack_j=stack_j)

    grams = pl.pallas_call(
        kernel,
        out_shape=jax.ShapeDtypeStruct((N, J * C, C), jnp.float32),
        grid_spec=pltpu.PrefetchScalarGridSpec(
            num_scalar_prefetch=0,
            grid=(N, K),                                   # reduction axis last
            in_specs=[
                pl.BlockSpec((1, C, T), lambda n, k: (n, 0, k)),    # features
                pl.BlockSpec((J, 1, T), lambda n, k: (0, 0, k)),    # masks^2
            ],
            out_specs=pl.BlockSpec((1, J * C, C), lambda n, k: (n, 0, 0)),
            scratch_shapes=[pltpu.VMEM((J * C, C), jnp.float32)],
        ),
        compiler_params=pltpu.CompilerParams(
            dimension_semantics=("parallel", "arbitrary"),
            vmem_limit_bytes=_pick_vmem_limit_bytes()),
    )(feats, masks)
    # TODO(synk): on v7x with N == 1 add a leading size-2 "parallel" grid axis
    # that splits the K range per TensorCore and combine partial grams below.

    # Tiny scalar epilogue in plain JAX: F.mse_loss is a mean over the N*C*C
    # gram elements, then *= weight * mask_mean, summed over j.  (Both .div()
    # calls in the original module are non-in-place no-ops.)
    grams = grams.reshape(N, J, C, C)
    tgt = jnp.transpose(targets, (1, 0, 2, 3)).astype(jnp.float32)   # (N,J,C,C)
    diff = grams - tgt
    mse = jnp.sum(diff * diff, axis=(0, 2, 3)) / float(N * C * C)    # (J,)
    loss = jnp.sum(mse * msk_mean) * weight
    return x, loss


# ----------------------------------------------------------------------------
# "capture" mode (module __init__): builds the target grams once.  One-shot
# parameter setup, kept in plain JAX (accuracy over speed).
# ----------------------------------------------------------------------------
def capture_targets(target_features, target_masks):
    # target_features: (J, N, C, H, W); target_masks: (J, 1, 1, H, W)
    J, N, C, H, W = target_features.shape
    tf = target_features.reshape(J, N, C, H * W)
    tm = target_masks.reshape(J, 1, 1, H * W)
    masked = tf * tm
    G = jnp.einsum('jnch,jndh->jncd', masked, masked,
                   precision=lax.Precision.HIGHEST) / float(C * H * W)
    return G.astype(jnp.float32)


# ----------------------------------------------------------------------------
# Pure-numpy (float64) reference of the loss path, for a correctness check.
# ----------------------------------------------------------------------------
def _ref_loss(x, input_masks, targets, weight):
    x = np.asarray(x, np.float64)
    masks = np.asarray(input_masks, np.float64)
    targets = np.asarray(targets, np.float64)
    N, C, H, W = x.shape
    J = masks.shape[0]
    feats = x.reshape(N, C, H * W)
    loss = 0.0
    for j in range(J):
        msk = masks[j].reshape(1, 1, H * W)
        masked = feats * msk
        G = np.einsum('nch,ndh->ncd', masked, masked) / float(C * H * W)
        mse = np.mean((G - targets[j]) ** 2)
        loss += mse * weight * masks[j].mean()
    return loss


if __name__ == "__main__":
    key = jax.random.PRNGKey(0)
    N, C, H, W = 2, 8, 16, 16
    J = 3                       # number of color codes / segmentation labels
    weight = 100.0

    k1, k2, k3, k4 = jax.random.split(key, 4)

    # Input feature map (what a conv layer would feed into this loss module).
    x = jax.random.normal(k1, (N, C, H, W), dtype=jnp.float32)

    # Binary segmentation masks (a partition of the spatial map into J labels),
    # shape (J, 1, 1, H, W), for input and target images.
    in_logits = jax.random.normal(k2, (J, H, W), dtype=jnp.float32)
    input_masks = jax.nn.one_hot(jnp.argmax(in_logits, axis=0), J,
                                 dtype=jnp.float32)          # (H, W, J)
    input_masks = jnp.transpose(input_masks, (2, 0, 1)).reshape(J, 1, 1, H, W)

    tgt_logits = jax.random.normal(k3, (J, H, W), dtype=jnp.float32)
    target_masks = jax.nn.one_hot(jnp.argmax(tgt_logits, axis=0), J,
                                  dtype=jnp.float32)
    target_masks = jnp.transpose(target_masks, (2, 0, 1)).reshape(J, 1, 1, H, W)

    # Target features per color code (the 'capture' pass of the module).
    target_features = jax.random.normal(k4, (J, N, C, H, W), dtype=jnp.float32)
    targets = capture_targets(target_features, target_masks)   # (J, N, C, C)

    # hw_tile=128 -> K=2 HW tiles, so the resident-accumulator path is used.
    fwd = jax.jit(functools.partial(style_loss_seg_forward,
                                    weight=weight, hw_tile=128))
    out, loss = fwd(x, input_masks, targets)
    jax.block_until_ready((out, loss))

    # Forward returns its input unchanged.
    np.testing.assert_allclose(np.asarray(out), np.asarray(x))
    # Loss matches the float64 reference of the PyTorch semantics.  Tolerance
    # covers the bf16 feature/mask streams (f32 accumulation is kept in-kernel
    # via preferred_element_type); measured error is ~1e-3 relative.
    ref = _ref_loss(x, input_masks, targets, weight)
    np.testing.assert_allclose(float(loss), ref, rtol=1e-2, atol=1e-8)

    print("KERNEL_OK")
</pallas_src>

<mosaic_0001>
module attributes {stable_mosaic.version = 11 : i64} {
  func.func @_masked_gram_kernel(%arg0: i32, %arg1: i32, %arg2: memref<1x8x128xbf16, #tpu.memory_space<vmem>>, %arg3: memref<3x1x128xbf16, #tpu.memory_space<vmem>>, %arg4: memref<1x24x8xf32, #tpu.memory_space<vmem>>, %arg5: memref<24x8xf32, #tpu.memory_space<vmem>>) attributes {dimension_semantics = [#tpu.dimension_semantics<parallel>, #tpu.dimension_semantics<arbitrary>], iteration_bounds = array<i64: 2, 2>, scalar_prefetch = 0 : i64, scratch_operands = 1 : i64, tpu.core_type = #tpu.core_type<tc>, window_params = [{transform_indices = @transform_0, window_bounds = array<i64: 1, 8, 128>}, {transform_indices = @transform_1, window_bounds = array<i64: 3, 1, 128>}, {transform_indices = @transform_2, window_bounds = array<i64: 1, 24, 8>}]} {
    %c0_i32 = arith.constant 0 : i32
    %0 = arith.cmpi eq, %arg1, %c0_i32 : i32
    %1 = arith.extui %0 : i1 to i32
    %c0_i32_0 = arith.constant 0 : i32
    %2 = arith.cmpi ne, %1, %c0_i32_0 : i32
    scf.if %2 {
      %cst_11 = arith.constant 0.000000e+00 : f32
      %18 = vector.broadcast %cst_11 : f32 to vector<24x8xf32>
      %c0_12 = arith.constant 0 : index
      %c0_13 = arith.constant 0 : index
      %19 = vector.load %arg5[%c0_12, %c0_13] : memref<24x8xf32, #tpu.memory_space<vmem>>, vector<24x8xf32>
      tpu.vector_store %arg5[%c0_12, %c0_13], %18 {strides = array<i32>} : memref<24x8xf32, #tpu.memory_space<vmem>>, vector<24x8xf32>,
    } else {
    }
    %c0 = arith.constant 0 : index
    %c0_1 = arith.constant 0 : index
    %c0_2 = arith.constant 0 : index
    %3 = vector.load %arg2[%c0, %c0_1, %c0_2] : memref<1x8x128xbf16, #tpu.memory_space<vmem>>, vector<1x8x128xbf16>
    %4 = vector.shape_cast %3 : vector<1x8x128xbf16> to vector<8x128xbf16>
    %c0_3 = arith.constant 0 : index
    %c0_4 = arith.constant 0 : index
    %c0_5 = arith.constant 0 : index
    %5 = vector.load %arg3[%c0_3, %c0_4, %c0_5] : memref<3x1x128xbf16, #tpu.memory_space<vmem>>, vector<3x1x128xbf16>
    %6 = vector.shape_cast %4 : vector<8x128xbf16> to vector<1x8x128xbf16>
    %7 = vector.broadcast %6 : vector<1x8x128xbf16> to vector<3x8x128xbf16>
    %8 = vector.broadcast %5 : vector<3x1x128xbf16> to vector<3x8x128xbf16>
    %9 = arith.mulf %7, %8 : vector<3x8x128xbf16>
    %10 = vector.shape_cast %9 : vector<3x8x128xbf16> to vector<24x128xbf16>
    %c0_6 = arith.constant 0 : index
    %c0_7 = arith.constant 0 : index
    %11 = vector.load %arg5[%c0_6, %c0_7] : memref<24x8xf32, #tpu.memory_space<vmem>>, vector<24x8xf32>
    %cst = arith.constant dense<0.000000e+00> : vector<24x8xf32>
    %12 = tpu.matmul %10, %4, %cst {dimension_numbers = #tpu.dot_dimension_numbers<[1], [1], [0], [0], [0, 0, 1, 0], [], []>} : vector<24x128xbf16>, vector<8x128xbf16>, vector<24x8xf32> -> vector<24x8xf32>
    %13 = arith.addf %11, %12 : vector<24x8xf32>
    %c0_8 = arith.constant 0 : index
    %c0_9 = arith.constant 0 : index
    %14 = vector.load %arg5[%c0_8, %c0_9] : memref<24x8xf32, #tpu.memory_space<vmem>>, vector<24x8xf32>
    tpu.vector_store %arg5[%c0_8, %c0_9], %13 {strides = array<i32>} : memref<24x8xf32, #tpu.memory_space<vmem>>, vector<24x8xf32>,
    %c1_i32 = arith.constant 1 : i32
    %15 = arith.cmpi eq, %arg1, %c1_i32 : i32
    %16 = arith.extui %15 : i1 to i32
    %c0_i32_10 = arith.constant 0 : i32
    %17 = arith.cmpi ne, %16, %c0_i32_10 : i32
    scf.if %17 {
      %c0_11 = arith.constant 0 : index
      %c0_12 = arith.constant 0 : index
      %18 = vector.load %arg5[%c0_11, %c0_12] : memref<24x8xf32, #tpu.memory_space<vmem>>, vector<24x8xf32>
      %cst_13 = arith.constant 4.8828125E-4 : f32
      %19 = vector.broadcast %cst_13 : f32 to vector<24x8xf32>
      %20 = arith.mulf %18, %19 : vector<24x8xf32>
      %c0_14 = arith.constant 0 : index
      %c0_15 = arith.constant 0 : index
      %c0_16 = arith.constant 0 : index
      %21 = vector.load %arg4[%c0_14, %c0_15, %c0_16] : memref<1x24x8xf32, #tpu.memory_space<vmem>>, vector<1x24x8xf32>
      %22 = vector.shape_cast %21 : vector<1x24x8xf32> to vector<24x8xf32>
      %23 = vector.shape_cast %20 : vector<24x8xf32> to vector<1x24x8xf32>
      tpu.vector_store %arg4[%c0_14, %c0_15, %c0_16], %23 {strides = array<i32>} : memref<1x24x8xf32, #tpu.memory_space<vmem>>, vector<1x24x8xf32>,
    } else {
    }
    return
  }
  func.func @transform_0(%arg0: i32, %arg1: i32) -> (i32, i32, i32) {
    %c0_i32 = arith.constant 0 : i32
    %c0_i32_0 = arith.constant 0 : i32
    return %arg0, %c0_i32, %arg1 : i32, i32, i32
  }
  func.func @transform_1(%arg0: i32, %arg1: i32) -> (i32, i32, i32) {
    %c0_i32 = arith.constant 0 : i32
    %c0_i32_0 = arith.constant 0 : i32
    %c0_i32_1 = arith.constant 0 : i32
    return %c0_i32, %c0_i32_0, %arg1 : i32, i32, i32
  }
  func.func @transform_2(%arg0: i32, %arg1: i32) -> (i32, i32, i32) {
    %c0_i32 = arith.constant 0 : i32
    %c0_i32_0 = arith.constant 0 : i32
    %c0_i32_1 = arith.constant 0 : i32
    return %arg0, %c0_i32, %c0_i32_0 : i32, i32, i32
  }
}

</mosaic_0001>

<bundles_post_ra>
// kernel: style_loss_seg_forward.1
= control target key start
LH: loop header
LB: loop body
LE: loop exit
PB: predicated region body
PF: predicated region fallthrough
CT: control target
= control target key end

     0   :  { %s591_s9 = smov 0   ;;  %s593_s10 = smov 0   ;;  %s695_s0 = inlined_call_operand.vmem [shape: bf16[2,8,256], index: 0, kind: input, shape index: {}]   ;;  %s696_s1 = inlined_call_operand.vmem [shape: bf16[3,1,256], index: 1, kind: input, shape index: {}]   ;;  %s697_s2 = inlined_call_operand.vmem [shape: f32[2,24,8], index: 2, kind: output, shape index: {}]  }
   0x1   :  { %s595_s11 = smov 0   ;;  %s597_s12 = smov 0  }
   0x2   :  { %s599_s13 = smov 0   ;;  %s601_s14 = smov 0  }
   0x3   :  { %s603_s15 = smov 0  }
   0x4 LB: > { %s21_s16 = sadd.s32 1, %s565_s13  ;;  %s24_s17 = sadd.s32 1, %s569_s14  ;;  %s573_s15 = sphi %s603_s15, %s12_s15   ;;  %s569_s14 = sphi %s601_s14, %s703_s14   ;;  %s565_s13 = sphi %s599_s13, %s702_s13   ;;  %s561_s12 = sphi %s597_s12, %s701_s12   ;;  %s557_s11 = sphi %s595_s11, %s700_s11   ;;  %s553_s10 = sphi %s593_s10, %s699_s10   ;;  %s549_s9 = sphi %s591_s9, %s698_s9  }
   0x5   : > { %p22_p0 = scmp.ge.s32.totalorder %s21_s16, 2  ;;  %s59_s18 = sadd.s32 1, %s553_s10 }
   0x6   : > { %p66_p1 = scmp.ne.s32.totalorder %s553_s10, %s549_s9  ;;  %p67_p2 = scmp.eq.s32.totalorder %s573_s15, 0 }
   0x7   : > { %s705_s16 = smov (%p22_p0, %s21_s16), 0  ;;  %s707_s17 = smov (!%p22_p0, %s24_s17), %s569_s14 }
   0x8   : > { %s56_s19 = ssub.s32 %s565_s13, %s705_s16  ;;  %p68_p3 = por %p67_p2, %p66_p1 }
   0x9   : > { %p26_p4 = scmp.ge.s32.totalorder %s707_s17, 2  ;;  %p57_p5 = scmp.eq.s32.totalorder %s56_s19, 0 }
   0xa   : > { %p439_p6 = scmp.ge.s32.totalorder %s573_s15, 4 }
   0xb   : > { %s709_s17 = smov (%p26_p4, %s707_s17), 0 }
   0xc   : > { %s640_s20 = scalar_select %p57_p5, %s553_s10, %s59_s18  }
   0xd   : > { %118 = sbr.rel (%p439_p6) target bundleno = 24 (0x18), region = 16 }
  0x12   : > { %132 = sbr.rel (!%p68_p3) target bundleno = 24 (0x18), region = 24  ;;  %s134_s21 = sand.u32 (%p68_p3), 1, %s553_s10  }
  0x13   : > { %s137_s24 = scalar_lea.vmem (%p68_p3), %s696_s1, %s565_s13  ;;  %s459_s25 = smul.u32 (%p68_p3), 3, %s134_s21 }
  0x14   : > { %v154_v0 = vld [vmem:[%s137_s24] sm:$0x1] (%p68_p3)  ;;  %v156_v1 = vld [vmem:[%s137_s24 + $0x2] sm:$0x1] (%p68_p3)  ;;  %v158_v2 = vld [vmem:[%s137_s24 + $0x4] sm:$0x1] (%p68_p3) }
  0x15   : > { %s136_s26 = scalar_lea.vmem (%p68_p3), [#allocation3], %s459_s25 }
  0x16   : > { %155 = vst [vmem:[%s136_s26] sm:$0x1] (%p68_p3), %v154_v0  ;;  %157 = vst [vmem:[%s136_s26 + $0x1] sm:$0x1] (%p68_p3), %v156_v1 }
  0x17   : > { %159 = vst [vmem:[%s136_s26 + $0x2] sm:$0x1] %v158_v2 }
  0x18 PF: > { %p440_p7 = scmp.ge.s32.totalorder %s573_s15, 1  ;;  %p180_p8 = scmp.lt.s32.totalorder %s573_s15, 5 }
  0x1a   : > { %p181_p9 = pnand %p440_p7, %p180_p8 }
  0x1b   : > { %s187_s27 = sand.u32 (!%p181_p9), 1, %s549_s9   ;;  %p216_p10 = scmp.lt.s32.totalorder (!%p181_p9), %s561_s12, 1 }
  0x1c   : > { %184 = sbr.rel (%p181_p9) target bundleno = 269 (0x10d), region = 58  ;;  %p218_p11 = scmp.lt.s32.totalorder (!%p181_p9), %s557_s11, 1 }
  0x1d   : > { %s460_s28 = smul.u32 (!%p181_p9), 3, %s187_s27  ;;  %p444_p12 = scmp.ne.s32.totalorder (!%p181_p9), %s557_s11, 0 }
  0x1f   : > { %s189_s22 = scalar_lea.vmem (!%p181_p9), [#allocation3], %s460_s28 }
  0x21   : > { %s711_s12 = smov (!%p216_p10, %s561_s12), 1 }
  0x22   : > { %s219_s29 = scalar_select %p218_p11, %s557_s11, 1 }
  0x23   : > { %s441_s30 = sshll.u32 %s711_s12, 1  ;;  %s461_s3 = smul.u32 24, %s711_s12 }
  0x24   : > { %s221_s4 = sadd.s32 %s441_s30, %s219_s29  ;;  %233 = sbr.rel (%p444_p12) target bundleno = 44 (0x2c), region = 66 }
  0x25   : > { %s442_s5 = sshll.u32 %s221_s4, 2  ;;  %s658_s8 = scalar_lea.vmem %s697_s2, %s461_s3 }
  0x26   : > { %s223_s21 = scalar_lea.vmem %s695_s0, %s442_s5 }
  0x29   : > { %vm234_vm0 = vcmask 64512   ;;  %v575_v3 = vmov 0.0  }
  0x2a   : > { %235 = vst.msk [vmem:[#allocation2] sm:$0xff] %vm234_vm0, %v575_v3  ;;  %236 = vst.msk [vmem:[#allocation2 + $0x8] sm:$0xff] %vm234_vm0, %v575_v3 }
  0x2b   : > { %237 = vst.msk [vmem:[#allocation2 + $0x10] sm:$0xff] %vm234_vm0, %v575_v3 }
  0x2c PF: > { %v238_v4 = vld [vmem:[%s223_s21] sm:$0xf]  ;;  %v239_v5 = vld [vmem:[%s189_s22] sm:$0x1]  ;;  %v240_v6 = vld [vmem:[%s189_s22 + $0x1] sm:$0x1]  ;;  %v245_v7 = vlaneseq }
  0x2d   : > { %453 = vmatprep.subr.bf16.mxu0 %v238_v4  ;;  %v241_v8 = vld [vmem:[%s189_s22 + $0x2] sm:$0x1]  ;;  %v243_v9 = vpack.i.b16 %v239_v5, %v239_v5  ;;  %v250_v11 = vpack.i.b16 %v240_v6, %v240_v6  ;;  %vm330_vm1 = vcmask 64512   ;;  %p447_p13 = scmp.ne.s32.totalorder %s557_s11, 1 }
  0x2e   : > { %454 = vmatpush3.bf16.xpose.msra.mxu0 %v238_v4  ;;  %v246_v10 = vshrl.u32 %v245_v7, 7  ;;  %v257_v12 = vpack.i.b16 %v241_v8, %v241_v8 }
  0x30   : > { %v247_v13 = vsub.s32 0, %v246_v10 }
  0x31   : > { %v266_v24 = vld [vmem:[#allocation2] sm:$0xff]  ;;  %v267_v29 = vld [vmem:[#allocation2 + $0x8] sm:$0xff] }
  0x32   : > { %v248_v14 = vrot.slane %v243_v9, %v247_v13  ;;  %v255_v15 = vrot.slane %v250_v11, %v247_v13  ;;  %v262_v16 = vrot.slane %v257_v12, %v247_v13  ;;  %v268_v22 = vld [vmem:[#allocation2 + $0x10] sm:$0xff] }
  0x34   : > { %v263_v17 = vmul.bf16 %v248_v14, %v238_v4  ;;  %v264_v18 = vmul.bf16 %v255_v15, %v238_v4  ;;  %v265_v19 = vmul.bf16 %v262_v16, %v238_v4 }
  0x36   : > { %v445_v20 = vcombine.low %v263_v17, %v264_v18  ;;  %v446_v21 = vcombine.low %v265_v19, %v265_v19 }
  0x38   : > { %455 = vmatprep.mubr.bf16.mxu0 %v445_v20 }
  0x39   : > { %456 = vmatmul.mubr.bf16.vlgmr.msra.gmra.mxu0 %v446_v21 }
  0xf9   : > { %v457_v23 = vpop.f32.mrf.mxu0 }
  0xfa   : > { %v329_v25 = vadd.f32 %v457_v23, %v268_v22 }
  0xfb   : > { %v313_v26 = vpop.f32.mrf.mxu0 }
  0xfc   : > { %333 = vst.msk [vmem:[#allocation2 + $0x10] sm:$0xff] %vm330_vm1, %v329_v25  ;;  %v327_v27 = vadd.f32 %v313_v26, %v266_v24 }
  0xfd   : > { %v458_v28 = vpop.f32.mrf.mxu0 }
  0xfe   : > { %331 = vst.msk [vmem:[#allocation2] sm:$0xff] %vm330_vm1, %v327_v27  ;;  %337 = sbr.rel (%p447_p13) target bundleno = 269 (0x10d), region = 70 }
  0xff   : > { %v316_v30 = vpop.f32.mrf.mxu0 }
 0x100   : > { %v328_v31 = vadd.f32 %v316_v30, %v267_v29 }
 0x102   : > { %332 = vst.msk [vmem:[#allocation2 + $0x8] sm:$0xff] %vm330_vm1, %v328_v31 }
 0x103   : > { %v340_v34 = vld [vmem:[#allocation2 + $0x10] sm:$0xff] }
 0x104   : > { %v343_v37 = vmul.f32 0.00048828125, %v340_v34 }
 0x105   : > { %v338_v32 = vld [vmem:[#allocation2] sm:$0xff] }
 0x106   : > { %v341_v35 = vmul.f32 0.00048828125, %v338_v32  ;;  %346 = vst.msk [vmem:[%s658_s8 + $0x10] sm:$0xff] %vm330_vm1, %v343_v37 }
 0x108   : > { %344 = vst.msk [vmem:[%s658_s8] sm:$0xff] %vm330_vm1, %v341_v35 }
 0x109   : > { %v339_v33 = vld [vmem:[#allocation2 + $0x8] sm:$0xff] }
 0x10a   : > { %v342_v36 = vmul.f32 0.00048828125, %v339_v33 }
 0x10c   : > { %345 = vst.msk [vmem:[%s658_s8 + $0x8] sm:$0xff] %vm330_vm1, %v342_v36 }
 0x10d PF: > { %s12_s15 = sadd.s32 1, %s573_s15   ;;  %s698_s9 = smov %s553_s10 }
 0x10e   : > { %p9_p0 = scmp.ge.s32.totalorder %s12_s15, 6   ;;  %s699_s10 = smov %s640_s20 }
 0x10f   : > { %s700_s11 = smov %s565_s13  ;;  %s701_s12 = smov %s569_s14 }
 0x110   : > { %s702_s13 = smov %s705_s16  ;;  %s703_s14 = smov %s709_s17 }
 0x111   :  { %11 = sbr.rel (!%p9_p0) target bundleno = 4 (0x4), region = 108 }

</bundles_post_ra>
